<compile_context>
chip_gen: v7x
topology: tpu7x:2x2x1
jax: 0.10.0
libtpu: 0.0.40
codegen_flags: <defaults>
</compile_context>

<pallas_src>
import jax
import jax.numpy as jnp
from jax.experimental import pallas as pl
from jax.experimental.pallas import tpu as pltpu


_LANES = 128       # vreg lane width
_ACC_SUBLANES = 8  # f32 accumulator sublane count


def _detect_tpu():
    """Return (num_parallel_cores, max_tile_rows) for the local TPU generation."""
    kind = ""
    try:
        kind = jax.devices()[0].device_kind.lower()
    except Exception:
        pass
    is_v7 = "v7" in kind
    num_cores = 2 if is_v7 else 1          # 2 TensorCores only on v7x
    max_tile_rows = 8192 if is_v7 else 4096  # 4 MiB / 2 MiB f32 blocks
    return num_cores, max_tile_rows


def _subscore_sse_kernel(diff_ref, acc_ref):
    # diff_ref : (TR, 128) lane-dense tile of (pred - gt), native dtype
    # acc_ref  : (8, 128) f32 partial sum-of-squares, one block per core
    i = pl.program_id(1)

    @pl.when(i == 0)
    def _():
        acc_ref[...] = jnp.zeros_like(acc_ref)

    d = diff_ref[...].astype(jnp.float32)
    sq = d * d
    tr = sq.shape[0]
    # Fold (TR, 128) -> (TR//8, 8, 128) and add into the (8, 128) accumulator:
    # pure VPU elementwise adds, no cross-lane reduction in the hot loop.
    acc_ref[...] += jnp.sum(
        sq.reshape(tr // _ACC_SUBLANES, _ACC_SUBLANES, _LANES), axis=0)


def subscore_mse_loss(x, ground_truth, num_segments, num_subactions,
                      min_pallas_elements=100_000):
    """num_segments / num_subactions are the original constructor args
    (the module internally uses num_segments - 2)."""
    S = num_segments - 2
    A = num_subactions

    assert x.ndim == 3 and ground_truth.ndim == 2
    N, S_x, D = x.shape
    assert x.shape[0] == ground_truth.shape[0]
    assert S_x == S, f"x.shape[1]={S_x} must equal num_segments-2={S}"
    assert ground_truth.shape[1] == A
    # Guard the strided gather (PyTorch would raise an index error here).
    assert 2 * A - 1 <= S, (
        f"need 2*num_subactions-1 (={2 * A - 1}) <= num_segments-2 (={S})")

    # Strided gather + subtraction in the wrapper; only the (N, A) diff slab
    # ever reaches the kernel (single HBM stream).
    pred = x[:, 0:2 * A - 1:2, 0]            # (N, A), native dtype
    diff = pred - ground_truth               # (N, A), promoted native dtype

    total = N * A

    # Small-problem fallback: launch + relayout overhead would dominate.
    if total < min_pallas_elements:
        return jnp.sum(jnp.square(diff.astype(jnp.float32))) / total

    num_cores, max_tile_rows = _detect_tpu()

    # Dtype-aware sublane rounding: 8 rows for 32-bit, 16 for bf16, 32 for int8.
    itemsize = jnp.dtype(diff.dtype).itemsize
    row_align = _ACC_SUBLANES * max(1, 4 // itemsize)

    rows = pl.cdiv(total, _LANES)
    rows_per_core = pl.cdiv(rows, num_cores)
    tile_rows = max(row_align,
                    min(max_tile_rows,
                        pl.cdiv(rows_per_core, row_align) * row_align))
    tiles_per_core = pl.cdiv(rows_per_core, tile_rows)
    padded_rows = num_cores * tiles_per_core * tile_rows
    padded_total = padded_rows * _LANES

    flat = diff.reshape(-1)
    flat = jnp.pad(flat, (0, padded_total - total))   # zero pad, keeps dtype
    diff_slab = flat.reshape(padded_rows, _LANES)

    partials = pl.pallas_call(
        _subscore_sse_kernel,
        out_shape=jax.ShapeDtypeStruct(
            (num_cores * _ACC_SUBLANES, _LANES), jnp.float32),
        grid=(num_cores, tiles_per_core),
        in_specs=[
            pl.BlockSpec((tile_rows, _LANES),
                         lambda c, i: (c * tiles_per_core + i, 0)),
        ],
        out_specs=pl.BlockSpec((_ACC_SUBLANES, _LANES), lambda c, i: (c, 0)),
        compiler_params=pltpu.CompilerParams(
            dimension_semantics=("parallel", "arbitrary")),
    )(diff_slab)

    # Combine per-core partial sums and divide by the true element count.
    return jnp.sum(partials) / total


if __name__ == "__main__":
    # Small shapes consistent with the module.
    num_segments = 18        # module uses num_segments - 2 = 16 internally
    num_subactions = 8       # 2*A - 1 = 15 <= 16  OK
    N, D = 4, 4
    S = num_segments - 2

    key = jax.random.PRNGKey(0)
    kx, kg = jax.random.split(key)
    x = jax.random.normal(kx, (N, S, D), dtype=jnp.float32)
    gt = jax.random.uniform(kg, (N, num_subactions), dtype=jnp.float32)

    # Force the Pallas path even at demo size (min_pallas_elements=0).
    loss = subscore_mse_loss(x, gt, num_segments, num_subactions,
                             min_pallas_elements=0)
    loss = jax.block_until_ready(loss)

    # Pure-JAX reference check.
    select_mask = jnp.arange(0, 2 * num_subactions - 1, 2)
    pred_ref = x[:, select_mask, 0]
    loss_ref = jnp.mean((pred_ref - gt) ** 2)
    assert jnp.allclose(loss, loss_ref, rtol=1e-5, atol=1e-6), (loss, loss_ref)

    # Also sanity-check the small-problem XLA fallback path.
    loss_fb = jax.block_until_ready(
        subscore_mse_loss(x, gt, num_segments, num_subactions))
    assert jnp.allclose(loss_fb, loss_ref, rtol=1e-5, atol=1e-6), (loss_fb, loss_ref)

    print("KERNEL_OK")
</pallas_src>

<mosaic_0001>
module attributes {stable_mosaic.version = 11 : i64} {
  func.func @_subscore_sse_kernel(%arg0: i32, %arg1: i32, %arg2: memref<8x128xf32, #tpu.memory_space<vmem>>, %arg3: memref<8x128xf32, #tpu.memory_space<vmem>>) attributes {dimension_semantics = [#tpu.dimension_semantics<parallel>, #tpu.dimension_semantics<arbitrary>], iteration_bounds = array<i64: 1, 1>, scalar_prefetch = 0 : i64, scratch_operands = 0 : i64, tpu.core_type = #tpu.core_type<tc>, window_params = [{transform_indices = @transform_0, window_bounds = array<i64: 8, 128>}, {transform_indices = @transform_1, window_bounds = array<i64: 8, 128>}]} {
    %c0_i32 = arith.constant 0 : i32
    %0 = arith.cmpi eq, %arg1, %c0_i32 : i32
    %1 = arith.extui %0 : i1 to i32
    %c0_i32_0 = arith.constant 0 : i32
    %2 = arith.cmpi ne, %1, %c0_i32_0 : i32
    scf.if %2 {
      %cst_6 = arith.constant 0.000000e+00 : f32
      %10 = vector.broadcast %cst_6 : f32 to vector<8x128xf32>
      %c0_7 = arith.constant 0 : index
      %c0_8 = arith.constant 0 : index
      %11 = vector.load %arg3[%c0_7, %c0_8] : memref<8x128xf32, #tpu.memory_space<vmem>>, vector<8x128xf32>
      tpu.vector_store %arg3[%c0_7, %c0_8], %10 {strides = array<i32>} : memref<8x128xf32, #tpu.memory_space<vmem>>, vector<8x128xf32>,
    } else {
    }
    %c0 = arith.constant 0 : index
    %c0_1 = arith.constant 0 : index
    %3 = vector.load %arg2[%c0, %c0_1] : memref<8x128xf32, #tpu.memory_space<vmem>>, vector<8x128xf32>
    %4 = arith.mulf %3, %3 : vector<8x128xf32>
    %c0_2 = arith.constant 0 : index
    %c0_3 = arith.constant 0 : index
    %5 = vector.load %arg3[%c0_2, %c0_3] : memref<8x128xf32, #tpu.memory_space<vmem>>, vector<8x128xf32>
    %6 = vector.shape_cast %4 : vector<8x128xf32> to vector<1x8x128xf32>
    %cst = arith.constant dense<0.000000e+00> : vector<8x128xf32>
    %7 = vector.multi_reduction <add>, %6, %cst [0] : vector<1x8x128xf32> to vector<8x128xf32>
    %8 = arith.addf %5, %7 : vector<8x128xf32>
    %c0_4 = arith.constant 0 : index
    %c0_5 = arith.constant 0 : index
    %9 = vector.load %arg3[%c0_4, %c0_5] : memref<8x128xf32, #tpu.memory_space<vmem>>, vector<8x128xf32>
    tpu.vector_store %arg3[%c0_4, %c0_5], %8 {strides = array<i32>} : memref<8x128xf32, #tpu.memory_space<vmem>>, vector<8x128xf32>,
    return
  }
  func.func @transform_0(%arg0: i32, %arg1: i32) -> (i32, i32) {
    %c1_i32 = arith.constant 1 : i32
    %0 = arith.muli %arg0, %c1_i32 : i32
    %1 = arith.addi %0, %arg1 : i32
    %c0_i32 = arith.constant 0 : i32
    %c0_i32_0 = arith.constant 0 : i32
    return %1, %c0_i32 : i32, i32
  }
  func.func @transform_1(%arg0: i32, %arg1: i32) -> (i32, i32) {
    %c0_i32 = arith.constant 0 : i32
    %c0_i32_0 = arith.constant 0 : i32
    return %arg0, %c0_i32 : i32, i32
  }
}

</mosaic_0001>

<bundles_post_ra>
// kernel: tpu_custom_call.1
= control target key start
LH: loop header
LB: loop body
LE: loop exit
PB: predicated region body
PF: predicated region fallthrough
CT: control target
= control target key end

     0   :  { %6 = vsyncpa [#allocation3], 0  ;;  %s138_s0 = inlined_call_operand.hbm [shape: f32[8,128], index: 0, kind: input, shape index: {}]   ;;  %s139_s1 = inlined_call_operand.hbm [shape: f32[8,128], index: 1, kind: output, shape index: {}]  }
   0x1   :  { %7 = vsyncpa [#allocation4], 0  ;;  %s102_s6 = smov [#allocation2]   ;;  %s54_s10 = scalar_lea.hbm %s138_s0, 128 }
   0x2   :  { %s17_s7 = sshll.u32 %s102_s6, 4  ;;  %p55_p0 = scmp.ne.s32.totalorder %s138_s0, %s54_s10  ;;  %s18_s7 = int_to_ptr.vmem [resolvable:$true] %s17_s7 }
   0x3   :  { %p58_p1 = scmp.lt.u32.totalorder %s54_s10, %s138_s0 }
   0x5   :  { %p60_p2 = pnand %p58_p1, %p55_p0 }
   0x7   :  { %63 = shalt.err (!%p60_p2)
}
   0x8   :  { %s64_s15 = scalar_lea.vmem %s18_s7, 128  ;;  %p69_p4 = scmp.lt.s32.totalorder %s18_s7, %s18_s7 }
   0x9   :  { %p65_p3 = scmp.ne.s32.totalorder %s18_s7, %s64_s15  ;;  %p70_p5 = scmp.lt.s32.totalorder %s64_s15, %s64_s15 }
   0xb   :  { %p71_p6 = por %p70_p5, %p69_p4 }
   0xd   :  { %p72_p7 = pnand %p71_p6, %p65_p3 }
   0xf   :  { %75 = shalt.err (!%p72_p7)
}
  0x10   :  { %20 = dma.hbm_to_vmem [thread:$0]  %s138_s0, 128, %s18_s7, [#allocation3]  }
  0x11   :  { %98 = dma.done.wait [#allocation3], 128  }
  0x12   :  { %99 = vsyncadd [#allocation3], 4294967168  ;;  %v30_v0 = vld [vmem:[#allocation2] sm:$0xff]  ;;  %s103_s18 = smov [#allocation5]  }
  0x13   :  { %s42_s19 = sshll.u32 %s103_s18, 4  ;;  %v31_v1 = vmul.f32 %v30_v0, %v30_v0  ;;  %s43_s19 = int_to_ptr.vmem [resolvable:$true] %s42_s19 }
  0x14   :  { %s76_s20 = scalar_lea.vmem %s43_s19, 128  ;;  %p81_p9 = scmp.lt.s32.totalorder %s43_s19, %s43_s19 }
  0x15   :  { %35 = vst [vmem:[#allocation5] sm:$0xff] %v31_v1  ;;  %p77_p8 = scmp.ne.s32.totalorder %s43_s19, %s76_s20  ;;  %p82_p10 = scmp.lt.s32.totalorder %s76_s20, %s76_s20 }
  0x17   :  { %p83_p11 = por %p82_p10, %p81_p9 }
  0x19   :  { %p84_p12 = pnand %p83_p11, %p77_p8 }
  0x1b   :  { %87 = shalt.err (!%p84_p12)
}
  0x1c   :  { %s88_s23 = scalar_lea.hbm %s139_s1, 128 }
  0x1d   :  { %p89_p13 = scmp.ne.s32.totalorder %s139_s1, %s88_s23  ;;  %p92_p0 = scmp.lt.u32.totalorder %s88_s23, %s139_s1 }
  0x1f   :  { %p94_p1 = pnand %p92_p0, %p89_p13 }
  0x21   :  { %97 = shalt.err (!%p94_p1)
}
  0x22   :  { %45 = dma.vmem_to_hbm [thread:$0]  %s43_s19, 128, %s139_s1, [#allocation4]  }
  0x23   :  { %100 = dma.done.wait [#allocation4], 128  }
  0x24   :  { %101 = vsyncadd [#allocation4], 4294967168 }
  0x25   :  { %49 = vsyncpa [#allocation3], 1 }
  0x26   :  { %50 = vsyncpa [#allocation4], 1 }

</bundles_post_ra>
